<compile_context>
chip_gen: v5e
topology: v5e:2x2
jax: 0.10.0
libtpu: 0.0.40
codegen_flags: <defaults>
</compile_context>

<pallas_src>
import jax
import jax.numpy as jnp
from jax import lax
from jax.experimental import pallas as pl
from jax.experimental.pallas import tpu as pltpu


# -----------------------------------------------------------------------------
# Kernels
# -----------------------------------------------------------------------------
def matmul_bias_kernel(x_ref, w_ref, b_ref, o_ref):
    """o = x @ W + b.  x:(TM,K)  w:(K,N)  b:(1,N)  o:(TM,N)."""
    o_ref[...] = (
        jnp.dot(x_ref[...], w_ref[...], preferred_element_type=jnp.float32)
        + b_ref[...]
    )


def rnn_recurrence_kernel(xp_ref, whh_ref, y_ref, hT_ref, h_scratch):
    """tanh recurrence over one chunk of timesteps.

    xp_ref : (T_CHUNK, batch, hidden)  precomputed x_t @ W_ih + b (streamed in)
    whh_ref: (hidden, hidden)          resident across the grid
    y_ref  : (T_CHUNK, batch, hidden)  per-timestep hidden states (streamed out)
    hT_ref : (batch, hidden)           final hidden state (resident output)
    h_scratch: (batch, hidden)         carries h_t across seq chunks
    """
    s = pl.program_id(0)

    @pl.when(s == 0)
    def _():
        h_scratch[...] = jnp.zeros_like(h_scratch)

    t_chunk = xp_ref.shape[0]

    def body(t, h):
        h_new = jnp.tanh(
            xp_ref[t]
            + jnp.dot(h, whh_ref[...], preferred_element_type=jnp.float32)
        )
        y_ref[t] = h_new
        return h_new

    # h is carried in registers across the (unrolled) chunk; VMEM scratch is
    # touched only once per chunk.
    h_final = lax.fori_loop(0, t_chunk, body, h_scratch[...], unroll=True)
    h_scratch[...] = h_final

    @pl.when(s == pl.num_programs(0) - 1)
    def _():
        hT_ref[...] = h_final


# -----------------------------------------------------------------------------
# pallas_call wrappers
# -----------------------------------------------------------------------------
def _largest_divisor_leq(n, cap):
    c = min(n, cap)
    while n % c:
        c -= 1
    return c


def _matmul_bias(x, w, b, *, tm_cap=512):
    """Row-tiled (TM, K) x (K, N) + b with a 'parallel' grid over rows."""
    rows, k = x.shape
    n = w.shape[1]
    tm = rows if rows <= tm_cap else tm_cap          # full dim or multiple of 8
    grid = (pl.cdiv(rows, tm),)
    return pl.pallas_call(
        matmul_bias_kernel,
        out_shape=jax.ShapeDtypeStruct((rows, n), jnp.float32),
        grid_spec=pltpu.PrefetchScalarGridSpec(
            num_scalar_prefetch=0,
            grid=grid,
            in_specs=[
                pl.BlockSpec((tm, k), lambda i: (i, 0)),
                pl.BlockSpec((k, n), lambda i: (0, 0)),   # weights resident
                pl.BlockSpec((1, n), lambda i: (0, 0)),   # bias resident
            ],
            out_specs=pl.BlockSpec((tm, n), lambda i: (i, 0)),
        ),
        compiler_params=pltpu.CompilerParams(
            dimension_semantics=("parallel",)),
    )(x, w, b)


def _rnn_layer(xproj, w_hh, *, t_cap=16):
    """Run the serial tanh recurrence over seq chunks with resident W_hh / h."""
    seq, batch, hidden = xproj.shape
    t_chunk = _largest_divisor_leq(seq, t_cap)
    grid = (seq // t_chunk,)
    y, h_T = pl.pallas_call(
        rnn_recurrence_kernel,
        out_shape=(
            jax.ShapeDtypeStruct((seq, batch, hidden), jnp.float32),
            jax.ShapeDtypeStruct((batch, hidden), jnp.float32),
        ),
        grid_spec=pltpu.PrefetchScalarGridSpec(
            num_scalar_prefetch=0,
            grid=grid,
            in_specs=[
                pl.BlockSpec((t_chunk, batch, hidden), lambda s: (s, 0, 0)),
                pl.BlockSpec((hidden, hidden), lambda s: (0, 0)),
            ],
            out_specs=(
                pl.BlockSpec((t_chunk, batch, hidden), lambda s: (s, 0, 0)),
                pl.BlockSpec((batch, hidden), lambda s: (0, 0)),
            ),
            scratch_shapes=[pltpu.VMEM((batch, hidden), jnp.float32)],
        ),
        compiler_params=pltpu.CompilerParams(
            dimension_semantics=("arbitrary",)),   # serial recurrence
    )(xproj, w_hh)
    return y, h_T


# -----------------------------------------------------------------------------
# Wrapper (mirrors Model.forward)
# -----------------------------------------------------------------------------
def model_forward(x, params):
    """x: (batch, seq, input_size) float32 (PyTorch batch_first convention).

    Returns (out, hidden):
      out    : (batch*seq, output_size)
      hidden : (n_layers, batch, hidden_dim)
    """
    batch, seq, _ = x.shape
    hidden_dim = params["layers"][0][1].shape[0]

    # Time-major so the per-timestep slice is contiguous in the trailing dims.
    inp_tm = jnp.transpose(x, (1, 0, 2))            # (seq, batch, in_dim)

    final_hiddens = []
    for (w_ih, w_hh, b) in params["layers"]:
        in_dim = w_ih.shape[0]
        # Hoisted input projection: one large MXU matmul for the whole sequence.
        xproj = _matmul_bias(
            inp_tm.reshape(seq * batch, in_dim), w_ih, b
        ).reshape(seq, batch, hidden_dim)
        y, h_T = _rnn_layer(xproj, w_hh)
        final_hiddens.append(h_T)
        inp_tm = y                                   # next layer's input

    hidden = jnp.stack(final_hiddens, axis=0)        # (n_layers, batch, hidden)

    # FC on the time-major (seq*batch, hidden) layout (free reshape, no
    # transpose of the big hidden tensor); only the small output is reordered
    # to torch's batch-major row order (row = b*seq + t).
    w_fc, b_fc = params["fc"]
    output_size = w_fc.shape[1]
    out_tm = _matmul_bias(inp_tm.reshape(seq * batch, hidden_dim), w_fc, b_fc)
    out = (
        out_tm.reshape(seq, batch, output_size)
        .transpose(1, 0, 2)
        .reshape(batch * seq, output_size)
    )
    return out, hidden


# -----------------------------------------------------------------------------
# Deterministic parameter init (same shapes / init range as nn.RNN + nn.Linear)
# -----------------------------------------------------------------------------
def init_params(key, input_size, hidden_dim, n_layers, output_size):
    k = 1.0 / jnp.sqrt(jnp.float32(hidden_dim))
    layers = []
    for layer in range(n_layers):
        in_dim = input_size if layer == 0 else hidden_dim
        key, k1, k2, k3, k4 = jax.random.split(key, 5)
        w_ih = jax.random.uniform(k1, (in_dim, hidden_dim), jnp.float32, -k, k)
        w_hh = jax.random.uniform(k2, (hidden_dim, hidden_dim), jnp.float32, -k, k)
        b_ih = jax.random.uniform(k3, (hidden_dim,), jnp.float32, -k, k)
        b_hh = jax.random.uniform(k4, (hidden_dim,), jnp.float32, -k, k)
        layers.append((w_ih, w_hh, (b_ih + b_hh).reshape(1, hidden_dim)))
    key, k5, k6 = jax.random.split(key, 3)
    w_fc = jax.random.uniform(k5, (hidden_dim, output_size), jnp.float32, -k, k)
    b_fc = jax.random.uniform(k6, (output_size,), jnp.float32, -k, k).reshape(
        1, output_size
    )
    return {"layers": layers, "fc": (w_fc, b_fc)}


# -----------------------------------------------------------------------------
# Pure-JAX reference (for correctness check only)
# -----------------------------------------------------------------------------
def reference_forward(x, params):
    batch, seq, _ = x.shape
    hidden_dim = params["layers"][0][1].shape[0]
    inp = x  # (batch, seq, in_dim)
    final_h = []
    for (w_ih, w_hh, b) in params["layers"]:
        h = jnp.zeros((batch, hidden_dim), jnp.float32)
        ys = []
        for t in range(seq):
            h = jnp.tanh(inp[:, t, :] @ w_ih + h @ w_hh + b)
            ys.append(h)
        inp = jnp.stack(ys, axis=1)
        final_h.append(h)
    hidden = jnp.stack(final_h, axis=0)
    w_fc, b_fc = params["fc"]
    out = inp.reshape(batch * seq, hidden_dim) @ w_fc + b_fc
    return out, hidden


# -----------------------------------------------------------------------------
if __name__ == "__main__":
    batch, seq = 2, 8
    input_size, hidden_dim, n_layers, output_size = 16, 32, 2, 12

    key = jax.random.PRNGKey(0)
    key, xk, pk = jax.random.split(key, 3)
    x = jax.random.normal(xk, (batch, seq, input_size), jnp.float32)
    params = init_params(pk, input_size, hidden_dim, n_layers, output_size)

    out, hidden = jax.jit(model_forward)(x, params)
    out = jax.block_until_ready(out)
    hidden = jax.block_until_ready(hidden)

    # Sanity-check against pure-JAX reference.
    out_ref, hidden_ref = reference_forward(x, params)
    assert out.shape == (batch * seq, output_size)
    assert hidden.shape == (n_layers, batch, hidden_dim)
    assert jnp.allclose(out, out_ref, atol=1e-5, rtol=1e-5)
    assert jnp.allclose(hidden, hidden_ref, atol=1e-5, rtol=1e-5)

    print("KERNEL_OK")
</pallas_src>

<mosaic_0001>
module attributes {stable_mosaic.version = 11 : i64} {
  func.func @matmul_bias_kernel(%arg0: i32, %arg1: memref<16x32xf32, #tpu.memory_space<vmem>>, %arg2: memref<32x32xf32, #tpu.memory_space<vmem>>, %arg3: memref<1x32xf32, #tpu.memory_space<vmem>>, %arg4: memref<16x32xf32, #tpu.memory_space<vmem>>) attributes {dimension_semantics = [#tpu.dimension_semantics<parallel>], iteration_bounds = array<i64: 1>, scalar_prefetch = 0 : i64, scratch_operands = 0 : i64, tpu.core_type = #tpu.core_type<tc>, window_params = [{transform_indices = @transform_0, window_bounds = array<i64: 16, 32>}, {pipeline_mode = #tpu.pipeline_mode<synchronous>, transform_indices = @transform_1, window_bounds = array<i64: 32, 32>}, {pipeline_mode = #tpu.pipeline_mode<synchronous>, transform_indices = @transform_2, window_bounds = array<i64: 1, 32>}, {transform_indices = @transform_3, window_bounds = array<i64: 16, 32>}]} {
    %c0 = arith.constant 0 : index
    %c0_0 = arith.constant 0 : index
    %0 = vector.load %arg1[%c0, %c0_0] : memref<16x32xf32, #tpu.memory_space<vmem>>, vector<16x32xf32>
    %c0_1 = arith.constant 0 : index
    %c0_2 = arith.constant 0 : index
    %1 = vector.load %arg2[%c0_1, %c0_2] : memref<32x32xf32, #tpu.memory_space<vmem>>, vector<32x32xf32>
    %cst = arith.constant dense<0.000000e+00> : vector<16x32xf32>
    %2 = tpu.matmul %0, %1, %cst {dimension_numbers = #tpu.dot_dimension_numbers<[1], [0], [0], [1], [0, 0, 1, 1], [], []>} : vector<16x32xf32>, vector<32x32xf32>, vector<16x32xf32> -> vector<16x32xf32>
    %c0_3 = arith.constant 0 : index
    %c0_4 = arith.constant 0 : index
    %3 = vector.load %arg3[%c0_3, %c0_4] : memref<1x32xf32, #tpu.memory_space<vmem>>, vector<1x32xf32>
    %4 = vector.broadcast %3 : vector<1x32xf32> to vector<16x32xf32>
    %5 = arith.addf %2, %4 : vector<16x32xf32>
    %c0_5 = arith.constant 0 : index
    %c0_6 = arith.constant 0 : index
    %6 = vector.load %arg4[%c0_5, %c0_6] : memref<16x32xf32, #tpu.memory_space<vmem>>, vector<16x32xf32>
    tpu.vector_store %arg4[%c0_5, %c0_6], %5 {strides = array<i32>} : memref<16x32xf32, #tpu.memory_space<vmem>>, vector<16x32xf32>,
    return
  }
  func.func @transform_0(%arg0: i32) -> (i32, i32) {
    %c0_i32 = arith.constant 0 : i32
    %c0_i32_0 = arith.constant 0 : i32
    return %arg0, %c0_i32 : i32, i32
  }
  func.func @transform_1(%arg0: i32) -> (i32, i32) {
    %c0_i32 = arith.constant 0 : i32
    %c0_i32_0 = arith.constant 0 : i32
    %c0_i32_1 = arith.constant 0 : i32
    return %c0_i32, %c0_i32_0 : i32, i32
  }
  func.func @transform_2(%arg0: i32) -> (i32, i32) {
    %c0_i32 = arith.constant 0 : i32
    %c0_i32_0 = arith.constant 0 : i32
    %c0_i32_1 = arith.constant 0 : i32
    return %c0_i32, %c0_i32_0 : i32, i32
  }
  func.func @transform_3(%arg0: i32) -> (i32, i32) {
    %c0_i32 = arith.constant 0 : i32
    %c0_i32_0 = arith.constant 0 : i32
    return %arg0, %c0_i32 : i32, i32
  }
}

module attributes {stable_mosaic.version = 11 : i64} {
  func.func @matmul_bias_kernel(%arg0: i32, %arg1: memref<16x16xf32, #tpu.memory_space<vmem>>, %arg2: memref<16x32xf32, #tpu.memory_space<vmem>>, %arg3: memref<1x32xf32, #tpu.memory_space<vmem>>, %arg4: memref<16x32xf32, #tpu.memory_space<vmem>>) attributes {dimension_semantics = [#tpu.dimension_semantics<parallel>], iteration_bounds = array<i64: 1>, scalar_prefetch = 0 : i64, scratch_operands = 0 : i64, tpu.core_type = #tpu.core_type<tc>, window_params = [{transform_indices = @transform_0, window_bounds = array<i64: 16, 16>}, {pipeline_mode = #tpu.pipeline_mode<synchronous>, transform_indices = @transform_1, window_bounds = array<i64: 16, 32>}, {pipeline_mode = #tpu.pipeline_mode<synchronous>, transform_indices = @transform_2, window_bounds = array<i64: 1, 32>}, {transform_indices = @transform_3, window_bounds = array<i64: 16, 32>}]} {
    %c0 = arith.constant 0 : index
    %c0_0 = arith.constant 0 : index
    %0 = vector.load %arg1[%c0, %c0_0] : memref<16x16xf32, #tpu.memory_space<vmem>>, vector<16x16xf32>
    %c0_1 = arith.constant 0 : index
    %c0_2 = arith.constant 0 : index
    %1 = vector.load %arg2[%c0_1, %c0_2] : memref<16x32xf32, #tpu.memory_space<vmem>>, vector<16x32xf32>
    %cst = arith.constant dense<0.000000e+00> : vector<16x32xf32>
    %2 = tpu.matmul %0, %1, %cst {dimension_numbers = #tpu.dot_dimension_numbers<[1], [0], [0], [1], [0, 0, 1, 1], [], []>} : vector<16x16xf32>, vector<16x32xf32>, vector<16x32xf32> -> vector<16x32xf32>
    %c0_3 = arith.constant 0 : index
    %c0_4 = arith.constant 0 : index
    %3 = vector.load %arg3[%c0_3, %c0_4] : memref<1x32xf32, #tpu.memory_space<vmem>>, vector<1x32xf32>
    %4 = vector.broadcast %3 : vector<1x32xf32> to vector<16x32xf32>
    %5 = arith.addf %2, %4 : vector<16x32xf32>
    %c0_5 = arith.constant 0 : index
    %c0_6 = arith.constant 0 : index
    %6 = vector.load %arg4[%c0_5, %c0_6] : memref<16x32xf32, #tpu.memory_space<vmem>>, vector<16x32xf32>
    tpu.vector_store %arg4[%c0_5, %c0_6], %5 {strides = array<i32>} : memref<16x32xf32, #tpu.memory_space<vmem>>, vector<16x32xf32>,
    return
  }
  func.func @transform_0(%arg0: i32) -> (i32, i32) {
    %c0_i32 = arith.constant 0 : i32
    %c0_i32_0 = arith.constant 0 : i32
    return %arg0, %c0_i32 : i32, i32
  }
  func.func @transform_1(%arg0: i32) -> (i32, i32) {
    %c0_i32 = arith.constant 0 : i32
    %c0_i32_0 = arith.constant 0 : i32
    %c0_i32_1 = arith.constant 0 : i32
    return %c0_i32, %c0_i32_0 : i32, i32
  }
  func.func @transform_2(%arg0: i32) -> (i32, i32) {
    %c0_i32 = arith.constant 0 : i32
    %c0_i32_0 = arith.constant 0 : i32
    %c0_i32_1 = arith.constant 0 : i32
    return %c0_i32, %c0_i32_0 : i32, i32
  }
  func.func @transform_3(%arg0: i32) -> (i32, i32) {
    %c0_i32 = arith.constant 0 : i32
    %c0_i32_0 = arith.constant 0 : i32
    return %arg0, %c0_i32 : i32, i32
  }
}

module attributes {stable_mosaic.version = 11 : i64} {
  func.func @rnn_recurrence_kernel(%arg0: i32, %arg1: memref<8x2x32xf32, #tpu.memory_space<vmem>>, %arg2: memref<32x32xf32, #tpu.memory_space<vmem>>, %arg3: memref<8x2x32xf32, #tpu.memory_space<vmem>>, %arg4: memref<2x32xf32, #tpu.memory_space<vmem>>, %arg5: memref<2x32xf32, #tpu.memory_space<vmem>>) attributes {dimension_semantics = [#tpu.dimension_semantics<arbitrary>], iteration_bounds = array<i64: 1>, scalar_prefetch = 0 : i64, scratch_operands = 1 : i64, tpu.core_type = #tpu.core_type<tc>, window_params = [{transform_indices = @transform_0, window_bounds = array<i64: 8, 2, 32>}, {pipeline_mode = #tpu.pipeline_mode<synchronous>, transform_indices = @transform_1, window_bounds = array<i64: 32, 32>}, {transform_indices = @transform_2, window_bounds = array<i64: 8, 2, 32>}, {pipeline_mode = #tpu.pipeline_mode<synchronous>, transform_indices = @transform_3, window_bounds = array<i64: 2, 32>}]} {
    %c0_i32 = arith.constant 0 : i32
    %0 = arith.cmpi eq, %arg0, %c0_i32 : i32
    %1 = arith.extui %0 : i1 to i32
    %c0_i32_0 = arith.constant 0 : i32
    %2 = arith.cmpi ne, %1, %c0_i32_0 : i32
    scf.if %2 {
      %cst_62 = arith.constant 0.000000e+00 : f32
      %96 = vector.broadcast %cst_62 : f32 to vector<2x32xf32>
      %c0_63 = arith.constant 0 : index
      %c0_64 = arith.constant 0 : index
      %97 = vector.load %arg5[%c0_63, %c0_64] : memref<2x32xf32, #tpu.memory_space<vmem>>, vector<2x32xf32>
      tpu.vector_store %arg5[%c0_63, %c0_64], %96 {strides = array<i32>} : memref<2x32xf32, #tpu.memory_space<vmem>>, vector<2x32xf32>,
    } else {
    }
    %c0 = arith.constant 0 : index
    %c0_1 = arith.constant 0 : index
    %3 = vector.load %arg5[%c0, %c0_1] : memref<2x32xf32, #tpu.memory_space<vmem>>, vector<2x32xf32>
    %c0_i32_2 = arith.constant 0 : i32
    %4 = arith.index_cast %c0_i32_2 : i32 to index
    %c0_3 = arith.constant 0 : index
    %c0_4 = arith.constant 0 : index
    %5 = vector.load %arg1[%4, %c0_3, %c0_4] : memref<8x2x32xf32, #tpu.memory_space<vmem>>, vector<1x2x32xf32>
    %6 = vector.shape_cast %5 : vector<1x2x32xf32> to vector<2x32xf32>
    %c0_5 = arith.constant 0 : index
    %c0_6 = arith.constant 0 : index
    %7 = vector.load %arg2[%c0_5, %c0_6] : memref<32x32xf32, #tpu.memory_space<vmem>>, vector<32x32xf32>
    %cst = arith.constant dense<0.000000e+00> : vector<2x32xf32>
    %8 = tpu.matmul %3, %7, %cst {dimension_numbers = #tpu.dot_dimension_numbers<[1], [0], [0], [1], [0, 0, 1, 1], [], []>} : vector<2x32xf32>, vector<32x32xf32>, vector<2x32xf32> -> vector<2x32xf32>
    %9 = arith.addf %6, %8 : vector<2x32xf32>
    %10 = math.tanh %9 : vector<2x32xf32>
    %11 = arith.index_cast %c0_i32_2 : i32 to index
    %c0_7 = arith.constant 0 : index
    %c0_8 = arith.constant 0 : index
    %12 = vector.load %arg3[%11, %c0_7, %c0_8] : memref<8x2x32xf32, #tpu.memory_space<vmem>>, vector<1x2x32xf32>
    %13 = vector.shape_cast %12 : vector<1x2x32xf32> to vector<2x32xf32>
    %14 = vector.shape_cast %10 : vector<2x32xf32> to vector<1x2x32xf32>
    tpu.vector_store %arg3[%11, %c0_7, %c0_8], %14 {strides = array<i32>} : memref<8x2x32xf32, #tpu.memory_space<vmem>>, vector<1x2x32xf32>,
    %c1_i32 = arith.constant 1 : i32
    %15 = arith.index_cast %c1_i32 : i32 to index
    %c0_9 = arith.constant 0 : index
    %c0_10 = arith.constant 0 : index
    %16 = vector.load %arg1[%15, %c0_9, %c0_10] : memref<8x2x32xf32, #tpu.memory_space<vmem>>, vector<1x2x32xf32>
    %17 = vector.shape_cast %16 : vector<1x2x32xf32> to vector<2x32xf32>
    %c0_11 = arith.constant 0 : index
    %c0_12 = arith.constant 0 : index
    %18 = vector.load %arg2[%c0_11, %c0_12] : memref<32x32xf32, #tpu.memory_space<vmem>>, vector<32x32xf32>
    %cst_13 = arith.constant dense<0.000000e+00> : vector<2x32xf32>
    %19 = tpu.matmul %10, %18, %cst_13 {dimension_numbers = #tpu.dot_dimension_numbers<[1], [0], [0], [1], [0, 0, 1, 1], [], []>} : vector<2x32xf32>, vector<32x32xf32>, vector<2x32xf32> -> vector<2x32xf32>
    %20 = arith.addf %17, %19 : vector<2x32xf32>
    %21 = math.tanh %20 : vector<2x32xf32>
    %22 = arith.index_cast %c1_i32 : i32 to index
    %c0_14 = arith.constant 0 : index
    %c0_15 = arith.constant 0 : index
    %23 = vector.load %arg3[%22, %c0_14, %c0_15] : memref<8x2x32xf32, #tpu.memory_space<vmem>>, vector<1x2x32xf32>
    %24 = vector.shape_cast %23 : vector<1x2x32xf32> to vector<2x32xf32>
    %25 = vector.shape_cast %21 : vector<2x32xf32> to vector<1x2x32xf32>
    tpu.vector_store %arg3[%22, %c0_14, %c0_15], %25 {strides = array<i32>} : memref<8x2x32xf32, #tpu.memory_space<vmem>>, vector<1x2x32xf32>,
    %c2_i32 = arith.constant 2 : i32
    %26 = arith.index_cast %c2_i32 : i32 to index
    %c0_16 = arith.constant 0 : index
    %c0_17 = arith.constant 0 : index
    %27 = vector.load %arg1[%26, %c0_16, %c0_17] : memref<8x2x32xf32, #tpu.memory_space<vmem>>, vector<1x2x32xf32>
    %28 = vector.shape_cast %27 : vector<1x2x32xf32> to vector<2x32xf32>
    %c0_18 = arith.constant 0 : index
    %c0_19 = arith.constant 0 : index
    %29 = vector.load %arg2[%c0_18, %c0_19] : memref<32x32xf32, #tpu.memory_space<vmem>>, vector<32x32xf32>
    %cst_20 = arith.constant dense<0.000000e+00> : vector<2x32xf32>
    %30 = tpu.matmul %21, %29, %cst_20 {dimension_numbers = #tpu.dot_dimension_numbers<[1], [0], [0], [1], [0, 0, 1, 1], [], []>} : vector<2x32xf32>, vector<32x32xf32>, vector<2x32xf32> -> vector<2x32xf32>
    %31 = arith.addf %28, %30 : vector<2x32xf32>
    %32 = math.tanh %31 : vector<2x32xf32>
    %33 = arith.index_cast %c2_i32 : i32 to index
    %c0_21 = arith.constant 0 : index
    %c0_22 = arith.constant 0 : index
    %34 = vector.load %arg3[%33, %c0_21, %c0_22] : memref<8x2x32xf32, #tpu.memory_space<vmem>>, vector<1x2x32xf32>
    %35 = vector.shape_cast %34 : vector<1x2x32xf32> to vector<2x32xf32>
    %36 = vector.shape_cast %32 : vector<2x32xf32> to vector<1x2x32xf32>
    tpu.vector_store %arg3[%33, %c0_21, %c0_22], %36 {strides = array<i32>} : memref<8x2x32xf32, #tpu.memory_space<vmem>>, vector<1x2x32xf32>,
    %c3_i32 = arith.constant 3 : i32
    %37 = arith.index_cast %c3_i32 : i32 to index
    %c0_23 = arith.constant 0 : index
    %c0_24 = arith.constant 0 : index
    %38 = vector.load %arg1[%37, %c0_23, %c0_24] : memref<8x2x32xf32, #tpu.memory_space<vmem>>, vector<1x2x32xf32>
    %39 = vector.shape_cast %38 : vector<1x2x32xf32> to vector<2x32xf32>
    %c0_25 = arith.constant 0 : index
    %c0_26 = arith.constant 0 : index
    %40 = vector.load %arg2[%c0_25, %c0_26] : memref<32x32xf32, #tpu.memory_space<vmem>>, vector<32x32xf32>
    %cst_27 = arith.constant dense<0.000000e+00> : vector<2x32xf32>
    %41 = tpu.matmul %32, %40, %cst_27 {dimension_numbers = #tpu.dot_dimension_numbers<[1], [0], [0], [1], [0, 0, 1, 1], [], []>} : vector<2x32xf32>, vector<32x32xf32>, vector<2x32xf32> -> vector<2x32xf32>
    %42 = arith.addf %39, %41 : vector<2x32xf32>
    %43 = math.tanh %42 : vector<2x32xf32>
    %44 = arith.index_cast %c3_i32 : i32 to index
    %c0_28 = arith.constant 0 : index
    %c0_29 = arith.constant 0 : index
    %45 = vector.load %arg3[%44, %c0_28, %c0_29] : memref<8x2x32xf32, #tpu.memory_space<vmem>>, vector<1x2x32xf32>
    %46 = vector.shape_cast %45 : vector<1x2x32xf32> to vector<2x32xf32>
    %47 = vector.shape_cast %43 : vector<2x32xf32> to vector<1x2x32xf32>
    tpu.vector_store %arg3[%44, %c0_28, %c0_29], %47 {strides = array<i32>} : memref<8x2x32xf32, #tpu.memory_space<vmem>>, vector<1x2x32xf32>,
    %c4_i32 = arith.constant 4 : i32
    %48 = arith.index_cast %c4_i32 : i32 to index
    %c0_30 = arith.constant 0 : index
    %c0_31 = arith.constant 0 : index
    %49 = vector.load %arg1[%48, %c0_30, %c0_31] : memref<8x2x32xf32, #tpu.memory_space<vmem>>, vector<1x2x32xf32>
    %50 = vector.shape_cast %49 : vector<1x2x32xf32> to vector<2x32xf32>
    %c0_32 = arith.constant 0 : index
    %c0_33 = arith.constant 0 : index
    %51 = vector.load %arg2[%c0_32, %c0_33] : memref<32x32xf32, #tpu.memory_space<vmem>>, vector<32x32xf32>
    %cst_34 = arith.constant dense<0.000000e+00> : vector<2x32xf32>
    %52 = tpu.matmul %43, %51, %cst_34 {dimension_numbers = #tpu.dot_dimension_numbers<[1], [0], [0], [1], [0, 0, 1, 1], [], []>} : vector<2x32xf32>, vector<32x32xf32>, vector<2x32xf32> -> vector<2x32xf32>
    %53 = arith.addf %50, %52 : vector<2x32xf32>
    %54 = math.tanh %53 : vector<2x32xf32>
    %55 = arith.index_cast %c4_i32 : i32 to index
    %c0_35 = arith.constant 0 : index
    %c0_36 = arith.constant 0 : index
    %56 = vector.load %arg3[%55, %c0_35, %c0_36] : memref<8x2x32xf32, #tpu.memory_space<vmem>>, vector<1x2x32xf32>
    %57 = vector.shape_cast %56 : vector<1x2x32xf32> to vector<2x32xf32>
    %58 = vector.shape_cast %54 : vector<2x32xf32> to vector<1x2x32xf32>
    tpu.vector_store %arg3[%55, %c0_35, %c0_36], %58 {strides = array<i32>} : memref<8x2x32xf32, #tpu.memory_space<vmem>>, vector<1x2x32xf32>,
    %c5_i32 = arith.constant 5 : i32
    %59 = arith.index_cast %c5_i32 : i32 to index
    %c0_37 = arith.constant 0 : index
    %c0_38 = arith.constant 0 : index
    %60 = vector.load %arg1[%59, %c0_37, %c0_38] : memref<8x2x32xf32, #tpu.memory_space<vmem>>, vector<1x2x32xf32>
    %61 = vector.shape_cast %60 : vector<1x2x32xf32> to vector<2x32xf32>
    %c0_39 = arith.constant 0 : index
    %c0_40 = arith.constant 0 : index
    %62 = vector.load %arg2[%c0_39, %c0_40] : memref<32x32xf32, #tpu.memory_space<vmem>>, vector<32x32xf32>
    %cst_41 = arith.constant dense<0.000000e+00> : vector<2x32xf32>
    %63 = tpu.matmul %54, %62, %cst_41 {dimension_numbers = #tpu.dot_dimension_numbers<[1], [0], [0], [1], [0, 0, 1, 1], [], []>} : vector<2x32xf32>, vector<32x32xf32>, vector<2x32xf32> -> vector<2x32xf32>
    %64 = arith.addf %61, %63 : vector<2x32xf32>
    %65 = math.tanh %64 : vector<2x32xf32>
    %66 = arith.index_cast %c5_i32 : i32 to index
    %c0_42 = arith.constant 0 : index
    %c0_43 = arith.constant 0 : index
    %67 = vector.load %arg3[%66, %c0_42, %c0_43] : memref<8x2x32xf32, #tpu.memory_space<vmem>>, vector<1x2x32xf32>
    %68 = vector.shape_cast %67 : vector<1x2x32xf32> to vector<2x32xf32>
    %69 = vector.shape_cast %65 : vector<2x32xf32> to vector<1x2x32xf32>
    tpu.vector_store %arg3[%66, %c0_42, %c0_43], %69 {strides = array<i32>} : memref<8x2x32xf32, #tpu.memory_space<vmem>>, vector<1x2x32xf32>,
    %c6_i32 = arith.constant 6 : i32
    %70 = arith.index_cast %c6_i32 : i32 to index
    %c0_44 = arith.constant 0 : index
    %c0_45 = arith.constant 0 : index
    %71 = vector.load %arg1[%70, %c0_44, %c0_45] : memref<8x2x32xf32, #tpu.memory_space<vmem>>, vector<1x2x32xf32>
    %72 = vector.shape_cast %71 : vector<1x2x32xf32> to vector<2x32xf32>
    %c0_46 = arith.constant 0 : index
    %c0_47 = arith.constant 0 : index
    %73 = vector.load %arg2[%c0_46, %c0_47] : memref<32x32xf32, #tpu.memory_space<vmem>>, vector<32x32xf32>
    %cst_48 = arith.constant dense<0.000000e+00> : vector<2x32xf32>
    %74 = tpu.matmul %65, %73, %cst_48 {dimension_numbers = #tpu.dot_dimension_numbers<[1], [0], [0], [1], [0, 0, 1, 1], [], []>} : vector<2x32xf32>, vector<32x32xf32>, vector<2x32xf32> -> vector<2x32xf32>
    %75 = arith.addf %72, %74 : vector<2x32xf32>
    %76 = math.tanh %75 : vector<2x32xf32>
    %77 = arith.index_cast %c6_i32 : i32 to index
    %c0_49 = arith.constant 0 : index
    %c0_50 = arith.constant 0 : index
    %78 = vector.load %arg3[%77, %c0_49, %c0_50] : memref<8x2x32xf32, #tpu.memory_space<vmem>>, vector<1x2x32xf32>
    %79 = vector.shape_cast %78 : vector<1x2x32xf32> to vector<2x32xf32>
    %80 = vector.shape_cast %76 : vector<2x32xf32> to vector<1x2x32xf32>
    tpu.vector_store %arg3[%77, %c0_49, %c0_50], %80 {strides = array<i32>} : memref<8x2x32xf32, #tpu.memory_space<vmem>>, vector<1x2x32xf32>,
    %c7_i32 = arith.constant 7 : i32
    %81 = arith.index_cast %c7_i32 : i32 to index
    %c0_51 = arith.constant 0 : index
    %c0_52 = arith.constant 0 : index
    %82 = vector.load %arg1[%81, %c0_51, %c0_52] : memref<8x2x32xf32, #tpu.memory_space<vmem>>, vector<1x2x32xf32>
    %83 = vector.shape_cast %82 : vector<1x2x32xf32> to vector<2x32xf32>
    %c0_53 = arith.constant 0 : index
    %c0_54 = arith.constant 0 : index
    %84 = vector.load %arg2[%c0_53, %c0_54] : memref<32x32xf32, #tpu.memory_space<vmem>>, vector<32x32xf32>
    %cst_55 = arith.constant dense<0.000000e+00> : vector<2x32xf32>
    %85 = tpu.matmul %76, %84, %cst_55 {dimension_numbers = #tpu.dot_dimension_numbers<[1], [0], [0], [1], [0, 0, 1, 1], [], []>} : vector<2x32xf32>, vector<32x32xf32>, vector<2x32xf32> -> vector<2x32xf32>
    %86 = arith.addf %83, %85 : vector<2x32xf32>
    %87 = math.tanh %86 : vector<2x32xf32>
    %88 = arith.index_cast %c7_i32 : i32 to index
    %c0_56 = arith.constant 0 : index
    %c0_57 = arith.constant 0 : index
    %89 = vector.load %arg3[%88, %c0_56, %c0_57] : memref<8x2x32xf32, #tpu.memory_space<vmem>>, vector<1x2x32xf32>
    %90 = vector.shape_cast %89 : vector<1x2x32xf32> to vector<2x32xf32>
    %91 = vector.shape_cast %87 : vector<2x32xf32> to vector<1x2x32xf32>
    tpu.vector_store %arg3[%88, %c0_56, %c0_57], %91 {strides = array<i32>} : memref<8x2x32xf32, #tpu.memory_space<vmem>>, vector<1x2x32xf32>,
    %c8_i32 = arith.constant 8 : i32
    %c0_58 = arith.constant 0 : index
    %c0_59 = arith.constant 0 : index
    %92 = vector.load %arg5[%c0_58, %c0_59] : memref<2x32xf32, #tpu.memory_space<vmem>>, vector<2x32xf32>
    tpu.vector_store %arg5[%c0_58, %c0_59], %87 {strides = array<i32>} : memref<2x32xf32, #tpu.memory_space<vmem>>, vector<2x32xf32>,
    %c0_i32_60 = arith.constant 0 : i32
    %93 = arith.cmpi eq, %arg0, %c0_i32_60 : i32
    %94 = arith.extui %93 : i1 to i32
    %c0_i32_61 = arith.constant 0 : i32
    %95 = arith.cmpi ne, %94, %c0_i32_61 : i32
    scf.if %95 {
      %c0_62 = arith.constant 0 : index
      %c0_63 = arith.constant 0 : index
      %96 = vector.load %arg4[%c0_62, %c0_63] : memref<2x32xf32, #tpu.memory_space<vmem>>, vector<2x32xf32>
      tpu.vector_store %arg4[%c0_62, %c0_63], %87 {strides = array<i32>} : memref<2x32xf32, #tpu.memory_space<vmem>>, vector<2x32xf32>,
    } else {
    }
    return
  }
  func.func @transform_0(%arg0: i32) -> (i32, i32, i32) {
    %c0_i32 = arith.constant 0 : i32
    %c0_i32_0 = arith.constant 0 : i32
    %c0_i32_1 = arith.constant 0 : i32
    return %arg0, %c0_i32, %c0_i32_0 : i32, i32, i32
  }
  func.func @transform_1(%arg0: i32) -> (i32, i32) {
    %c0_i32 = arith.constant 0 : i32
    %c0_i32_0 = arith.constant 0 : i32
    %c0_i32_1 = arith.constant 0 : i32
    return %c0_i32, %c0_i32_0 : i32, i32
  }
  func.func @transform_2(%arg0: i32) -> (i32, i32, i32) {
    %c0_i32 = arith.constant 0 : i32
    %c0_i32_0 = arith.constant 0 : i32
    %c0_i32_1 = arith.constant 0 : i32
    return %arg0, %c0_i32, %c0_i32_0 : i32, i32, i32
  }
  func.func @transform_3(%arg0: i32) -> (i32, i32) {
    %c0_i32 = arith.constant 0 : i32
    %c0_i32_0 = arith.constant 0 : i32
    %c0_i32_1 = arith.constant 0 : i32
    return %c0_i32, %c0_i32_0 : i32, i32
  }
}

module attributes {stable_mosaic.version = 11 : i64} {
  func.func @rnn_recurrence_kernel(%arg0: i32, %arg1: memref<8x2x32xf32, #tpu.memory_space<vmem>>, %arg2: memref<32x32xf32, #tpu.memory_space<vmem>>, %arg3: memref<8x2x32xf32, #tpu.memory_space<vmem>>, %arg4: memref<2x32xf32, #tpu.memory_space<vmem>>, %arg5: memref<2x32xf32, #tpu.memory_space<vmem>>) attributes {dimension_semantics = [#tpu.dimension_semantics<arbitrary>], iteration_bounds = array<i64: 1>, scalar_prefetch = 0 : i64, scratch_operands = 1 : i64, tpu.core_type = #tpu.core_type<tc>, window_params = [{transform_indices = @transform_0, window_bounds = array<i64: 8, 2, 32>}, {pipeline_mode = #tpu.pipeline_mode<synchronous>, transform_indices = @transform_1, window_bounds = array<i64: 32, 32>}, {transform_indices = @transform_2, window_bounds = array<i64: 8, 2, 32>}, {pipeline_mode = #tpu.pipeline_mode<synchronous>, transform_indices = @transform_3, window_bounds = array<i64: 2, 32>}]} {
    %c0_i32 = arith.constant 0 : i32
    %0 = arith.cmpi eq, %arg0, %c0_i32 : i32
    %1 = arith.extui %0 : i1 to i32
    %c0_i32_0 = arith.constant 0 : i32
    %2 = arith.cmpi ne, %1, %c0_i32_0 : i32
    scf.if %2 {
      %cst_62 = arith.constant 0.000000e+00 : f32
      %96 = vector.broadcast %cst_62 : f32 to vector<2x32xf32>
      %c0_63 = arith.constant 0 : index
      %c0_64 = arith.constant 0 : index
      %97 = vector.load %arg5[%c0_63, %c0_64] : memref<2x32xf32, #tpu.memory_space<vmem>>, vector<2x32xf32>
      tpu.vector_store %arg5[%c0_63, %c0_64], %96 {strides = array<i32>} : memref<2x32xf32, #tpu.memory_space<vmem>>, vector<2x32xf32>,
    } else {
    }
    %c0 = arith.constant 0 : index
    %c0_1 = arith.constant 0 : index
    %3 = vector.load %arg5[%c0, %c0_1] : memref<2x32xf32, #tpu.memory_space<vmem>>, vector<2x32xf32>
    %c0_i32_2 = arith.constant 0 : i32
    %4 = arith.index_cast %c0_i32_2 : i32 to index
    %c0_3 = arith.constant 0 : index
    %c0_4 = arith.constant 0 : index
    %5 = vector.load %arg1[%4, %c0_3, %c0_4] : memref<8x2x32xf32, #tpu.memory_space<vmem>>, vector<1x2x32xf32>
    %6 = vector.shape_cast %5 : vector<1x2x32xf32> to vector<2x32xf32>
    %c0_5 = arith.constant 0 : index
    %c0_6 = arith.constant 0 : index
    %7 = vector.load %arg2[%c0_5, %c0_6] : memref<32x32xf32, #tpu.memory_space<vmem>>, vector<32x32xf32>
    %cst = arith.constant dense<0.000000e+00> : vector<2x32xf32>
    %8 = tpu.matmul %3, %7, %cst {dimension_numbers = #tpu.dot_dimension_numbers<[1], [0], [0], [1], [0, 0, 1, 1], [], []>} : vector<2x32xf32>, vector<32x32xf32>, vector<2x32xf32> -> vector<2x32xf32>
    %9 = arith.addf %6, %8 : vector<2x32xf32>
    %10 = math.tanh %9 : vector<2x32xf32>
    %11 = arith.index_cast %c0_i32_2 : i32 to index
    %c0_7 = arith.constant 0 : index
    %c0_8 = arith.constant 0 : index
    %12 = vector.load %arg3[%11, %c0_7, %c0_8] : memref<8x2x32xf32, #tpu.memory_space<vmem>>, vector<1x2x32xf32>
    %13 = vector.shape_cast %12 : vector<1x2x32xf32> to vector<2x32xf32>
    %14 = vector.shape_cast %10 : vector<2x32xf32> to vector<1x2x32xf32>
    tpu.vector_store %arg3[%11, %c0_7, %c0_8], %14 {strides = array<i32>} : memref<8x2x32xf32, #tpu.memory_space<vmem>>, vector<1x2x32xf32>,
    %c1_i32 = arith.constant 1 : i32
    %15 = arith.index_cast %c1_i32 : i32 to index
    %c0_9 = arith.constant 0 : index
    %c0_10 = arith.constant 0 : index
    %16 = vector.load %arg1[%15, %c0_9, %c0_10] : memref<8x2x32xf32, #tpu.memory_space<vmem>>, vector<1x2x32xf32>
    %17 = vector.shape_cast %16 : vector<1x2x32xf32> to vector<2x32xf32>
    %c0_11 = arith.constant 0 : index
    %c0_12 = arith.constant 0 : index
    %18 = vector.load %arg2[%c0_11, %c0_12] : memref<32x32xf32, #tpu.memory_space<vmem>>, vector<32x32xf32>
    %cst_13 = arith.constant dense<0.000000e+00> : vector<2x32xf32>
    %19 = tpu.matmul %10, %18, %cst_13 {dimension_numbers = #tpu.dot_dimension_numbers<[1], [0], [0], [1], [0, 0, 1, 1], [], []>} : vector<2x32xf32>, vector<32x32xf32>, vector<2x32xf32> -> vector<2x32xf32>
    %20 = arith.addf %17, %19 : vector<2x32xf32>
    %21 = math.tanh %20 : vector<2x32xf32>
    %22 = arith.index_cast %c1_i32 : i32 to index
    %c0_14 = arith.constant 0 : index
    %c0_15 = arith.constant 0 : index
    %23 = vector.load %arg3[%22, %c0_14, %c0_15] : memref<8x2x32xf32, #tpu.memory_space<vmem>>, vector<1x2x32xf32>
    %24 = vector.shape_cast %23 : vector<1x2x32xf32> to vector<2x32xf32>
    %25 = vector.shape_cast %21 : vector<2x32xf32> to vector<1x2x32xf32>
    tpu.vector_store %arg3[%22, %c0_14, %c0_15], %25 {strides = array<i32>} : memref<8x2x32xf32, #tpu.memory_space<vmem>>, vector<1x2x32xf32>,
    %c2_i32 = arith.constant 2 : i32
    %26 = arith.index_cast %c2_i32 : i32 to index
    %c0_16 = arith.constant 0 : index
    %c0_17 = arith.constant 0 : index
    %27 = vector.load %arg1[%26, %c0_16, %c0_17] : memref<8x2x32xf32, #tpu.memory_space<vmem>>, vector<1x2x32xf32>
    %28 = vector.shape_cast %27 : vector<1x2x32xf32> to vector<2x32xf32>
    %c0_18 = arith.constant 0 : index
    %c0_19 = arith.constant 0 : index
    %29 = vector.load %arg2[%c0_18, %c0_19] : memref<32x32xf32, #tpu.memory_space<vmem>>, vector<32x32xf32>
    %cst_20 = arith.constant dense<0.000000e+00> : vector<2x32xf32>
    %30 = tpu.matmul %21, %29, %cst_20 {dimension_numbers = #tpu.dot_dimension_numbers<[1], [0], [0], [1], [0, 0, 1, 1], [], []>} : vector<2x32xf32>, vector<32x32xf32>, vector<2x32xf32> -> vector<2x32xf32>
    %31 = arith.addf %28, %30 : vector<2x32xf32>
    %32 = math.tanh %31 : vector<2x32xf32>
    %33 = arith.index_cast %c2_i32 : i32 to index
    %c0_21 = arith.constant 0 : index
    %c0_22 = arith.constant 0 : index
    %34 = vector.load %arg3[%33, %c0_21, %c0_22] : memref<8x2x32xf32, #tpu.memory_space<vmem>>, vector<1x2x32xf32>
    %35 = vector.shape_cast %34 : vector<1x2x32xf32> to vector<2x32xf32>
    %36 = vector.shape_cast %32 : vector<2x32xf32> to vector<1x2x32xf32>
    tpu.vector_store %arg3[%33, %c0_21, %c0_22], %36 {strides = array<i32>} : memref<8x2x32xf32, #tpu.memory_space<vmem>>, vector<1x2x32xf32>,
    %c3_i32 = arith.constant 3 : i32
    %37 = arith.index_cast %c3_i32 : i32 to index
    %c0_23 = arith.constant 0 : index
    %c0_24 = arith.constant 0 : index
    %38 = vector.load %arg1[%37, %c0_23, %c0_24] : memref<8x2x32xf32, #tpu.memory_space<vmem>>, vector<1x2x32xf32>
    %39 = vector.shape_cast %38 : vector<1x2x32xf32> to vector<2x32xf32>
    %c0_25 = arith.constant 0 : index
    %c0_26 = arith.constant 0 : index
    %40 = vector.load %arg2[%c0_25, %c0_26] : memref<32x32xf32, #tpu.memory_space<vmem>>, vector<32x32xf32>
    %cst_27 = arith.constant dense<0.000000e+00> : vector<2x32xf32>
    %41 = tpu.matmul %32, %40, %cst_27 {dimension_numbers = #tpu.dot_dimension_numbers<[1], [0], [0], [1], [0, 0, 1, 1], [], []>} : vector<2x32xf32>, vector<32x32xf32>, vector<2x32xf32> -> vector<2x32xf32>
    %42 = arith.addf %39, %41 : vector<2x32xf32>
    %43 = math.tanh %42 : vector<2x32xf32>
    %44 = arith.index_cast %c3_i32 : i32 to index
    %c0_28 = arith.constant 0 : index
    %c0_29 = arith.constant 0 : index
    %45 = vector.load %arg3[%44, %c0_28, %c0_29] : memref<8x2x32xf32, #tpu.memory_space<vmem>>, vector<1x2x32xf32>
    %46 = vector.shape_cast %45 : vector<1x2x32xf32> to vector<2x32xf32>
    %47 = vector.shape_cast %43 : vector<2x32xf32> to vector<1x2x32xf32>
    tpu.vector_store %arg3[%44, %c0_28, %c0_29], %47 {strides = array<i32>} : memref<8x2x32xf32, #tpu.memory_space<vmem>>, vector<1x2x32xf32>,
    %c4_i32 = arith.constant 4 : i32
    %48 = arith.index_cast %c4_i32 : i32 to index
    %c0_30 = arith.constant 0 : index
    %c0_31 = arith.constant 0 : index
    %49 = vector.load %arg1[%48, %c0_30, %c0_31] : memref<8x2x32xf32, #tpu.memory_space<vmem>>, vector<1x2x32xf32>
    %50 = vector.shape_cast %49 : vector<1x2x32xf32> to vector<2x32xf32>
    %c0_32 = arith.constant 0 : index
    %c0_33 = arith.constant 0 : index
    %51 = vector.load %arg2[%c0_32, %c0_33] : memref<32x32xf32, #tpu.memory_space<vmem>>, vector<32x32xf32>
    %cst_34 = arith.constant dense<0.000000e+00> : vector<2x32xf32>
    %52 = tpu.matmul %43, %51, %cst_34 {dimension_numbers = #tpu.dot_dimension_numbers<[1], [0], [0], [1], [0, 0, 1, 1], [], []>} : vector<2x32xf32>, vector<32x32xf32>, vector<2x32xf32> -> vector<2x32xf32>
    %53 = arith.addf %50, %52 : vector<2x32xf32>
    %54 = math.tanh %53 : vector<2x32xf32>
    %55 = arith.index_cast %c4_i32 : i32 to index
    %c0_35 = arith.constant 0 : index
    %c0_36 = arith.constant 0 : index
    %56 = vector.load %arg3[%55, %c0_35, %c0_36] : memref<8x2x32xf32, #tpu.memory_space<vmem>>, vector<1x2x32xf32>
    %57 = vector.shape_cast %56 : vector<1x2x32xf32> to vector<2x32xf32>
    %58 = vector.shape_cast %54 : vector<2x32xf32> to vector<1x2x32xf32>
    tpu.vector_store %arg3[%55, %c0_35, %c0_36], %58 {strides = array<i32>} : memref<8x2x32xf32, #tpu.memory_space<vmem>>, vector<1x2x32xf32>,
    %c5_i32 = arith.constant 5 : i32
    %59 = arith.index_cast %c5_i32 : i32 to index
    %c0_37 = arith.constant 0 : index
    %c0_38 = arith.constant 0 : index
    %60 = vector.load %arg1[%59, %c0_37, %c0_38] : memref<8x2x32xf32, #tpu.memory_space<vmem>>, vector<1x2x32xf32>
    %61 = vector.shape_cast %60 : vector<1x2x32xf32> to vector<2x32xf32>
    %c0_39 = arith.constant 0 : index
    %c0_40 = arith.constant 0 : index
    %62 = vector.load %arg2[%c0_39, %c0_40] : memref<32x32xf32, #tpu.memory_space<vmem>>, vector<32x32xf32>
    %cst_41 = arith.constant dense<0.000000e+00> : vector<2x32xf32>
    %63 = tpu.matmul %54, %62, %cst_41 {dimension_numbers = #tpu.dot_dimension_numbers<[1], [0], [0], [1], [0, 0, 1, 1], [], []>} : vector<2x32xf32>, vector<32x32xf32>, vector<2x32xf32> -> vector<2x32xf32>
    %64 = arith.addf %61, %63 : vector<2x32xf32>
    %65 = math.tanh %64 : vector<2x32xf32>
    %66 = arith.index_cast %c5_i32 : i32 to index
    %c0_42 = arith.constant 0 : index
    %c0_43 = arith.constant 0 : index
    %67 = vector.load %arg3[%66, %c0_42, %c0_43] : memref<8x2x32xf32, #tpu.memory_space<vmem>>, vector<1x2x32xf32>
    %68 = vector.shape_cast %67 : vector<1x2x32xf32> to vector<2x32xf32>
    %69 = vector.shape_cast %65 : vector<2x32xf32> to vector<1x2x32xf32>
    tpu.vector_store %arg3[%66, %c0_42, %c0_43], %69 {strides = array<i32>} : memref<8x2x32xf32, #tpu.memory_space<vmem>>, vector<1x2x32xf32>,
    %c6_i32 = arith.constant 6 : i32
    %70 = arith.index_cast %c6_i32 : i32 to index
    %c0_44 = arith.constant 0 : index
    %c0_45 = arith.constant 0 : index
    %71 = vector.load %arg1[%70, %c0_44, %c0_45] : memref<8x2x32xf32, #tpu.memory_space<vmem>>, vector<1x2x32xf32>
    %72 = vector.shape_cast %71 : vector<1x2x32xf32> to vector<2x32xf32>
    %c0_46 = arith.constant 0 : index
    %c0_47 = arith.constant 0 : index
    %73 = vector.load %arg2[%c0_46, %c0_47] : memref<32x32xf32, #tpu.memory_space<vmem>>, vector<32x32xf32>
    %cst_48 = arith.constant dense<0.000000e+00> : vector<2x32xf32>
    %74 = tpu.matmul %65, %73, %cst_48 {dimension_numbers = #tpu.dot_dimension_numbers<[1], [0], [0], [1], [0, 0, 1, 1], [], []>} : vector<2x32xf32>, vector<32x32xf32>, vector<2x32xf32> -> vector<2x32xf32>
    %75 = arith.addf %72, %74 : vector<2x32xf32>
    %76 = math.tanh %75 : vector<2x32xf32>
    %77 = arith.index_cast %c6_i32 : i32 to index
    %c0_49 = arith.constant 0 : index
    %c0_50 = arith.constant 0 : index
    %78 = vector.load %arg3[%77, %c0_49, %c0_50] : memref<8x2x32xf32, #tpu.memory_space<vmem>>, vector<1x2x32xf32>
    %79 = vector.shape_cast %78 : vector<1x2x32xf32> to vector<2x32xf32>
    %80 = vector.shape_cast %76 : vector<2x32xf32> to vector<1x2x32xf32>
    tpu.vector_store %arg3[%77, %c0_49, %c0_50], %80 {strides = array<i32>} : memref<8x2x32xf32, #tpu.memory_space<vmem>>, vector<1x2x32xf32>,
    %c7_i32 = arith.constant 7 : i32
    %81 = arith.index_cast %c7_i32 : i32 to index
    %c0_51 = arith.constant 0 : index
    %c0_52 = arith.constant 0 : index
    %82 = vector.load %arg1[%81, %c0_51, %c0_52] : memref<8x2x32xf32, #tpu.memory_space<vmem>>, vector<1x2x32xf32>
    %83 = vector.shape_cast %82 : vector<1x2x32xf32> to vector<2x32xf32>
    %c0_53 = arith.constant 0 : index
    %c0_54 = arith.constant 0 : index
    %84 = vector.load %arg2[%c0_53, %c0_54] : memref<32x32xf32, #tpu.memory_space<vmem>>, vector<32x32xf32>
    %cst_55 = arith.constant dense<0.000000e+00> : vector<2x32xf32>
    %85 = tpu.matmul %76, %84, %cst_55 {dimension_numbers = #tpu.dot_dimension_numbers<[1], [0], [0], [1], [0, 0, 1, 1], [], []>} : vector<2x32xf32>, vector<32x32xf32>, vector<2x32xf32> -> vector<2x32xf32>
    %86 = arith.addf %83, %85 : vector<2x32xf32>
    %87 = math.tanh %86 : vector<2x32xf32>
    %88 = arith.index_cast %c7_i32 : i32 to index
    %c0_56 = arith.constant 0 : index
    %c0_57 = arith.constant 0 : index
    %89 = vector.load %arg3[%88, %c0_56, %c0_57] : memref<8x2x32xf32, #tpu.memory_space<vmem>>, vector<1x2x32xf32>
    %90 = vector.shape_cast %89 : vector<1x2x32xf32> to vector<2x32xf32>
    %91 = vector.shape_cast %87 : vector<2x32xf32> to vector<1x2x32xf32>
    tpu.vector_store %arg3[%88, %c0_56, %c0_57], %91 {strides = array<i32>} : memref<8x2x32xf32, #tpu.memory_space<vmem>>, vector<1x2x32xf32>,
    %c8_i32 = arith.constant 8 : i32
    %c0_58 = arith.constant 0 : index
    %c0_59 = arith.constant 0 : index
    %92 = vector.load %arg5[%c0_58, %c0_59] : memref<2x32xf32, #tpu.memory_space<vmem>>, vector<2x32xf32>
    tpu.vector_store %arg5[%c0_58, %c0_59], %87 {strides = array<i32>} : memref<2x32xf32, #tpu.memory_space<vmem>>, vector<2x32xf32>,
    %c0_i32_60 = arith.constant 0 : i32
    %93 = arith.cmpi eq, %arg0, %c0_i32_60 : i32
    %94 = arith.extui %93 : i1 to i32
    %c0_i32_61 = arith.constant 0 : i32
    %95 = arith.cmpi ne, %94, %c0_i32_61 : i32
    scf.if %95 {
      %c0_62 = arith.constant 0 : index
      %c0_63 = arith.constant 0 : index
      %96 = vector.load %arg4[%c0_62, %c0_63] : memref<2x32xf32, #tpu.memory_space<vmem>>, vector<2x32xf32>
      tpu.vector_store %arg4[%c0_62, %c0_63], %87 {strides = array<i32>} : memref<2x32xf32, #tpu.memory_space<vmem>>, vector<2x32xf32>,
    } else {
    }
    return
  }
  func.func @transform_0(%arg0: i32) -> (i32, i32, i32) {
    %c0_i32 = arith.constant 0 : i32
    %c0_i32_0 = arith.constant 0 : i32
    %c0_i32_1 = arith.constant 0 : i32
    return %arg0, %c0_i32, %c0_i32_0 : i32, i32, i32
  }
  func.func @transform_1(%arg0: i32) -> (i32, i32) {
    %c0_i32 = arith.constant 0 : i32
    %c0_i32_0 = arith.constant 0 : i32
    %c0_i32_1 = arith.constant 0 : i32
    return %c0_i32, %c0_i32_0 : i32, i32
  }
  func.func @transform_2(%arg0: i32) -> (i32, i32, i32) {
    %c0_i32 = arith.constant 0 : i32
    %c0_i32_0 = arith.constant 0 : i32
    %c0_i32_1 = arith.constant 0 : i32
    return %arg0, %c0_i32, %c0_i32_0 : i32, i32, i32
  }
  func.func @transform_3(%arg0: i32) -> (i32, i32) {
    %c0_i32 = arith.constant 0 : i32
    %c0_i32_0 = arith.constant 0 : i32
    %c0_i32_1 = arith.constant 0 : i32
    return %c0_i32, %c0_i32_0 : i32, i32
  }
}

module attributes {stable_mosaic.version = 11 : i64} {
  func.func @matmul_bias_kernel(%arg0: i32, %arg1: memref<16x32xf32, #tpu.memory_space<vmem>>, %arg2: memref<32x12xf32, #tpu.memory_space<vmem>>, %arg3: memref<1x12xf32, #tpu.memory_space<vmem>>, %arg4: memref<16x12xf32, #tpu.memory_space<vmem>>) attributes {dimension_semantics = [#tpu.dimension_semantics<parallel>], iteration_bounds = array<i64: 1>, scalar_prefetch = 0 : i64, scratch_operands = 0 : i64, tpu.core_type = #tpu.core_type<tc>, window_params = [{transform_indices = @transform_0, window_bounds = array<i64: 16, 32>}, {pipeline_mode = #tpu.pipeline_mode<synchronous>, transform_indices = @transform_1, window_bounds = array<i64: 32, 12>}, {pipeline_mode = #tpu.pipeline_mode<synchronous>, transform_indices = @transform_2, window_bounds = array<i64: 1, 12>}, {transform_indices = @transform_3, window_bounds = array<i64: 16, 12>}]} {
    %c0 = arith.constant 0 : index
    %c0_0 = arith.constant 0 : index
    %0 = vector.load %arg1[%c0, %c0_0] : memref<16x32xf32, #tpu.memory_space<vmem>>, vector<16x32xf32>
    %c0_1 = arith.constant 0 : index
    %c0_2 = arith.constant 0 : index
    %1 = vector.load %arg2[%c0_1, %c0_2] : memref<32x12xf32, #tpu.memory_space<vmem>>, vector<32x12xf32>
    %cst = arith.constant dense<0.000000e+00> : vector<16x12xf32>
    %2 = tpu.matmul %0, %1, %cst {dimension_numbers = #tpu.dot_dimension_numbers<[1], [0], [0], [1], [0, 0, 1, 1], [], []>} : vector<16x32xf32>, vector<32x12xf32>, vector<16x12xf32> -> vector<16x12xf32>
    %c0_3 = arith.constant 0 : index
    %c0_4 = arith.constant 0 : index
    %3 = vector.load %arg3[%c0_3, %c0_4] : memref<1x12xf32, #tpu.memory_space<vmem>>, vector<1x12xf32>
    %4 = vector.broadcast %3 : vector<1x12xf32> to vector<16x12xf32>
    %5 = arith.addf %2, %4 : vector<16x12xf32>
    %c0_5 = arith.constant 0 : index
    %c0_6 = arith.constant 0 : index
    %6 = vector.load %arg4[%c0_5, %c0_6] : memref<16x12xf32, #tpu.memory_space<vmem>>, vector<16x12xf32>
    tpu.vector_store %arg4[%c0_5, %c0_6], %5 {strides = array<i32>} : memref<16x12xf32, #tpu.memory_space<vmem>>, vector<16x12xf32>,
    return
  }
  func.func @transform_0(%arg0: i32) -> (i32, i32) {
    %c0_i32 = arith.constant 0 : i32
    %c0_i32_0 = arith.constant 0 : i32
    return %arg0, %c0_i32 : i32, i32
  }
  func.func @transform_1(%arg0: i32) -> (i32, i32) {
    %c0_i32 = arith.constant 0 : i32
    %c0_i32_0 = arith.constant 0 : i32
    %c0_i32_1 = arith.constant 0 : i32
    return %c0_i32, %c0_i32_0 : i32, i32
  }
  func.func @transform_2(%arg0: i32) -> (i32, i32) {
    %c0_i32 = arith.constant 0 : i32
    %c0_i32_0 = arith.constant 0 : i32
    %c0_i32_1 = arith.constant 0 : i32
    return %c0_i32, %c0_i32_0 : i32, i32
  }
  func.func @transform_3(%arg0: i32) -> (i32, i32) {
    %c0_i32 = arith.constant 0 : i32
    %c0_i32_0 = arith.constant 0 : i32
    return %arg0, %c0_i32 : i32, i32
  }
}

</mosaic_0001>

<bundles_post_ra>
// kernel: model_forward.7
= control target key start
LH: loop header
LB: loop body
LE: loop exit
PB: predicated region body
PF: predicated region fallthrough
CT: control target
= control target key end

     0   :  { %8 = vsyncpa [#allocation3], 0  ;;  %s113_s15 = smov [#allocation2]   ;;  %s114_s17 = smov 128   ;;  %s154_s0 = inlined_call_operand.vmem [shape: f32[16,32], index: 0, kind: input, shape index: {}]   ;;  %s155_s1 = inlined_call_operand.hbm [shape: f32[32,32], index: 1, kind: input, shape index: {}]   ;;  %s156_s2 = inlined_call_operand.vmem [shape: f32[1,32], index: 2, kind: input, shape index: {}]   ;;  %s157_s3 = inlined_call_operand.vmem [shape: f32[16,32], index: 3, kind: output, shape index: {}]  }
   0x1   :  { %s15_s14 = sshll.u32 %s155_s1, 4  ;;  %s17_s16 = sshll.u32 %s113_s15, 4  ;;  %s16_s14 = int_to_ptr.hbm [resolvable:$true] %s15_s14  ;;  %s18_s16 = int_to_ptr.vmem [resolvable:$true] %s17_s16 }
   0x2   :  { %s115_s18 = smov 8  }
   0x3   :  { %23 = dma.hbm_to_vmem [thread:$0]  %s16_s14, 512, %s18_s16, [#allocation3], %s114_s17, %s114_s17, %s115_s18  }
   0x4   :  { %111 = dma.done.wait [#allocation3], 512  }
   0x5   :  { %112 = vsyncadd [#allocation3], 4294966784  ;;  %v35_v0 = vld [vmem:[#allocation2 + $0x18] sm:$0xff]  ;;  %v34_v1 = vld [vmem:[#allocation2 + $0x10] sm:$0xff]  ;;  %vm40_vm0 = vcmask 261120  }
   0x6   :  { %59 = vmatpush.msra.mxu0 %v35_v0  ;;  %79 = vmatpush.msra.mxu1 %v35_v0  ;;  %v33_v2 = vld [vmem:[#allocation2 + $0x8] sm:$0xff]  ;;  %v32_v3 = vld [vmem:[#allocation2] sm:$0xff] }
   0x7   :  { %v30_v4 = vld [vmem:[%s154_s0] sm:$0xff]  ;;  %v31_v5 = vld [vmem:[%s154_s0 + $0x8] sm:$0xff] }
   0x8   :  { %60 = vmatpush.msra.mxu0 %v34_v1  ;;  %80 = vmatpush.msra.mxu1 %v34_v1  ;;  %v86_v6 = vld [vmem:[%s156_s2] ss:$0 sm:$0xff] }
   0xa   :  { %61 = vmatpush.msra.mxu0 %v33_v2  ;;  %81 = vmatpush.msra.mxu1 %v33_v2 }
   0xc   :  { %62 = vmatpush.msra.mxu0 %v32_v3  ;;  %82 = vmatpush.msra.mxu1 %v32_v3 }
   0xd   :  { %77 = vmatmul.msk.f32.vlgmr.msra.gmra.mxu0 %vm40_vm0, %v30_v4  ;;  %78 = vmatmul.msk.f32.vlgmr.msra.gmra.mxu1 %vm40_vm0, %v31_v5 }
  0x8a   :  { %v64_v7 = vpop.f32.mrf.mxu0  ;;  %v67_v8 = vpop.f32.mrf.mxu1 }
  0x8b   :  { %v65_v9 = vadd.f32 %v86_v6, %v64_v7  ;;  %v68_v10 = vadd.f32 %v86_v6, %v67_v8 }
  0x8d   :  { %70 = vst.msk [vmem:[%s157_s3] sm:$0xff] %vm40_vm0, %v65_v9 }
  0x8e   :  { %71 = vst.msk [vmem:[%s157_s3 + $0x8] sm:$0xff] %vm40_vm0, %v68_v10 }
  0x8f   :  { %76 = vsyncpa [#allocation3], 1 }

// kernel: model_forward.5
= control target key start
LH: loop header
LB: loop body
LE: loop exit
PB: predicated region body
PF: predicated region fallthrough
CT: control target
= control target key end

     0   :  { %8 = vsyncpa [#allocation3], 0  ;;  %s110_s15 = smov [#allocation2]   ;;  %s111_s17 = smov 128   ;;  %s151_s0 = inlined_call_operand.vmem [shape: f32[16,16], index: 0, kind: input, shape index: {}]   ;;  %s152_s1 = inlined_call_operand.hbm [shape: f32[16,32], index: 1, kind: input, shape index: {}]   ;;  %s153_s2 = inlined_call_operand.vmem [shape: f32[1,32], index: 2, kind: input, shape index: {}]   ;;  %s154_s3 = inlined_call_operand.vmem [shape: f32[16,32], index: 3, kind: output, shape index: {}]  }
   0x1   :  { %s15_s14 = sshll.u32 %s152_s1, 4  ;;  %s17_s16 = sshll.u32 %s110_s15, 4  ;;  %s16_s14 = int_to_ptr.hbm [resolvable:$true] %s15_s14  ;;  %s18_s16 = int_to_ptr.vmem [resolvable:$true] %s17_s16 }
   0x2   :  { %s112_s18 = smov 8  }
   0x3   :  { %23 = dma.hbm_to_vmem [thread:$0]  %s16_s14, 256, %s18_s16, [#allocation3], %s111_s17, %s111_s17, %s112_s18  }
   0x4   :  { %108 = dma.done.wait [#allocation3], 256  }
   0x5   :  { %109 = vsyncadd [#allocation3], 4294967040  ;;  %v33_v0 = vld [vmem:[#allocation2 + $0x8] sm:$0xff]  ;;  %v32_v1 = vld [vmem:[#allocation2] sm:$0xff]  ;;  %vm38_vm0 = vcmask 130048   ;;  %vm68_vm1 = vcmask 261120  }
   0x6   :  { %59 = vmatpush.msra.mxu0 %v33_v0  ;;  %78 = vmatpush.msra.mxu1 %v33_v0  ;;  %v30_v2 = vld [vmem:[%s151_s0] sm:$0xff]  ;;  %v31_v3 = vld [vmem:[%s151_s0 + $0x8] sm:$0xff] }
   0x7   :  { %v83_v4 = vld [vmem:[%s153_s2] ss:$0 sm:$0xff] }
   0x8   :  { %60 = vmatpush.msra.mxu0 %v32_v1  ;;  %79 = vmatpush.msra.mxu1 %v32_v1 }
   0x9   :  { %76 = vmatmul.msk.f32.vlgmr.msra.gmra.mxu0 %vm38_vm0, %v30_v2  ;;  %77 = vmatmul.msk.f32.vlgmr.msra.gmra.mxu1 %vm38_vm0, %v31_v3 }
  0x86   :  { %v62_v5 = vpop.f32.mrf.mxu0  ;;  %v65_v6 = vpop.f32.mrf.mxu1 }
  0x87   :  { %v63_v7 = vadd.f32 %v83_v4, %v62_v5  ;;  %v66_v8 = vadd.f32 %v83_v4, %v65_v6 }
  0x89   :  { %69 = vst.msk [vmem:[%s154_s3] sm:$0xff] %vm68_vm1, %v63_v7 }
  0x8a   :  { %70 = vst.msk [vmem:[%s154_s3 + $0x8] sm:$0xff] %vm68_vm1, %v66_v8 }
  0x8b   :  { %75 = vsyncpa [#allocation3], 1 }

// kernel: model_forward.6
= control target key start
LH: loop header
LB: loop body
LE: loop exit
PB: predicated region body
PF: predicated region fallthrough
CT: control target
= control target key end

     0   :  { %vm17_vm0 = vcmask 254976   ;;  %v336_v2 = vmov 0.0   ;;  %vm25_vm1 = vcmask 261120   ;;  %s439_s1 = inlined_call_operand.vmem [shape: f32[32,32], index: 1, kind: input, shape index: {}]   ;;  %s440_s0 = inlined_call_operand.vmem [shape: f32[8,2,32], index: 0, kind: input, shape index: {}]   ;;  %s441_s2 = inlined_call_operand.vmem [shape: f32[8,2,32], index: 2, kind: output, shape index: {0}]   ;;  %s442_s3 = inlined_call_operand.vmem [shape: f32[2,32], index: 3, kind: output, shape index: {1}]  }
   0x1   :  { %v24_v0 = vld [vmem:[%s439_s1 + $0x18] sm:$0xff]  ;;  %v23_v1 = vld [vmem:[%s439_s1 + $0x10] sm:$0xff]  ;;  %18 = vst.msk [vmem:[#allocation2] sm:$0x3] %vm17_vm0, %v336_v2  ;;  %v22_v3 = vld [vmem:[%s439_s1 + $0x8] sm:$0xff] }
   0x2   :  { %41 = vmatpush.msra.mxu0 %v24_v0  ;;  %74 = vmatpush.msra.mxu1 %v24_v0  ;;  %v21_v4 = vld [vmem:[%s439_s1] sm:$0xff]  ;;  %v307_v22 = vld [vmem:[%s440_s0 + $0x8] sm:$0x3]  ;;  %v310_v26 = vld [vmem:[%s440_s0 + $0xa] sm:$0x3] }
   0x3   :  { %107 = vmatpush.msra.mxu2 %v24_v0  ;;  %140 = vmatpush.msra.mxu3 %v24_v0  ;;  %v20_v6 = vld [vmem:[%s440_s0] sm:$0x3]  ;;  %v298_v10 = vld [vmem:[%s440_s0 + $0x2] sm:$0x3]  ;;  %v301_v14 = vld [vmem:[%s440_s0 + $0x4] sm:$0x3] }
   0x4   :  { %42 = vmatpush.msra.mxu0 %v23_v1  ;;  %75 = vmatpush.msra.mxu1 %v23_v1  ;;  %v304_v18 = vld [vmem:[%s440_s0 + $0x6] sm:$0x3]  ;;  %v313_v30 = vld [vmem:[%s440_s0 + $0xc] sm:$0x3]  ;;  %v316_v34 = vld [vmem:[%s440_s0 + $0xe] sm:$0x3] }
   0x5   :  { %108 = vmatpush.msra.mxu2 %v23_v1  ;;  %141 = vmatpush.msra.mxu3 %v23_v1 }
   0x6   :  { %43 = vmatpush.msra.mxu0 %v22_v3  ;;  %76 = vmatpush.msra.mxu1 %v22_v3 }
   0x7   :  { %109 = vmatpush.msra.mxu2 %v22_v3  ;;  %142 = vmatpush.msra.mxu3 %v22_v3 }
   0x8   :  { %44 = vmatpush.msra.mxu0 %v21_v4  ;;  %v19_v5 = vld [vmem:[#allocation2] sm:$0x3]  ;;  %77 = vmatpush.msra.mxu1 %v21_v4 }
   0x9   :  { %297 = vmatmul.msk.f32.vlgmr.msra.gmra.mxu0 %vm25_vm1, %v19_v5  ;;  %110 = vmatpush.msra.mxu2 %v21_v4 }
   0xa   :  { %143 = vmatpush.msra.mxu3 %v21_v4  ;;  %173 = vmatpush.msrb.mxu0 %v24_v0 }
   0xb   :  { %206 = vmatpush.msrb.mxu1 %v24_v0  ;;  %239 = vmatpush.msrb.mxu2 %v24_v0 }
   0xc   :  { %174 = vmatpush.msrb.mxu0 %v23_v1  ;;  %272 = vmatpush.msrb.mxu3 %v24_v0 }
   0xd   :  { %207 = vmatpush.msrb.mxu1 %v23_v1  ;;  %240 = vmatpush.msrb.mxu2 %v23_v1 }
   0xe   :  { %175 = vmatpush.msrb.mxu0 %v22_v3  ;;  %273 = vmatpush.msrb.mxu3 %v23_v1 }
   0xf   :  { %208 = vmatpush.msrb.mxu1 %v22_v3  ;;  %241 = vmatpush.msrb.mxu2 %v22_v3 }
  0x10   :  { %176 = vmatpush.msrb.mxu0 %v21_v4  ;;  %274 = vmatpush.msrb.mxu3 %v22_v3 }
  0x11   :  { %209 = vmatpush.msrb.mxu1 %v21_v4  ;;  %242 = vmatpush.msrb.mxu2 %v21_v4 }
  0x12   :  { %275 = vmatpush.msrb.mxu3 %v21_v4 }
  0x86   :  { %v46_v7 = vpop.f32.mrf.mxu0 }
  0x87   :  { %v49_v8 = vadd.f32 %v46_v7, %v20_v6 }
  0x89   :  { %320 = vtanh.f32 %v49_v8 }
  0x8f   :  { %v321_v9 = vpop.eup %320 }
  0x90   :  { %52 = vst.msk [vmem:[%s441_s2] sm:$0x3] %vm17_vm0, %v321_v9  ;;  %299 = vmatmul.msk.f32.vlgmr.msra.gmra.mxu1 %vm25_vm1, %v321_v9 }
 0x10d   :  { %v79_v11 = vpop.f32.mrf.mxu1 }
 0x10e   :  { %v82_v12 = vadd.f32 %v298_v10, %v79_v11 }
 0x110   :  { %322 = vtanh.f32 %v82_v12 }
 0x116   :  { %v323_v13 = vpop.eup %322 }
 0x117   :  { %300 = vst.msk [vmem:[%s441_s2 + $0x2] sm:$0x3] %vm17_vm0, %v323_v13  ;;  %302 = vmatmul.msk.f32.vlgmr.msra.gmra.mxu2 %vm25_vm1, %v323_v13 }
 0x19a   :  { %v112_v15 = vpop.f32.mrf.mxu2 }
 0x19b   :  { %v115_v16 = vadd.f32 %v301_v14, %v112_v15 }
 0x19d   :  { %324 = vtanh.f32 %v115_v16 }
 0x1a3   :  { %v325_v17 = vpop.eup %324 }
 0x1a4   :  { %303 = vst.msk [vmem:[%s441_s2 + $0x4] sm:$0x3] %vm17_vm0, %v325_v17  ;;  %305 = vmatmul.msk.f32.vlgmr.msra.gmra.mxu3 %vm25_vm1, %v325_v17 }
 0x227   :  { %v145_v19 = vpop.f32.mrf.mxu3 }
 0x228   :  { %v148_v20 = vadd.f32 %v304_v18, %v145_v19 }
 0x22a   :  { %326 = vtanh.f32 %v148_v20 }
 0x230   :  { %v327_v21 = vpop.eup %326 }
 0x231   :  { %306 = vst.msk [vmem:[%s441_s2 + $0x6] sm:$0x3] %vm17_vm0, %v327_v21  ;;  %308 = vmatmul.msk.f32.vlgmr.msrb.gmra.mxu0 %vm25_vm1, %v327_v21 }
 0x2ae   :  { %v178_v23 = vpop.f32.mrf.mxu0 }
 0x2af   :  { %v181_v24 = vadd.f32 %v307_v22, %v178_v23 }
 0x2b1   :  { %328 = vtanh.f32 %v181_v24 }
 0x2b7   :  { %v329_v25 = vpop.eup %328 }
 0x2b8   :  { %309 = vst.msk [vmem:[%s441_s2 + $0x8] sm:$0x3] %vm17_vm0, %v329_v25  ;;  %311 = vmatmul.msk.f32.vlgmr.msrb.gmra.mxu1 %vm25_vm1, %v329_v25 }
 0x335   :  { %v211_v27 = vpop.f32.mrf.mxu1 }
 0x336   :  { %v214_v28 = vadd.f32 %v310_v26, %v211_v27 }
 0x338   :  { %330 = vtanh.f32 %v214_v28 }
 0x33e   :  { %v331_v29 = vpop.eup %330 }
 0x33f   :  { %312 = vst.msk [vmem:[%s441_s2 + $0xa] sm:$0x3] %vm17_vm0, %v331_v29  ;;  %314 = vmatmul.msk.f32.vlgmr.msrb.gmra.mxu2 %vm25_vm1, %v331_v29 }
 0x3c2   :  { %v244_v31 = vpop.f32.mrf.mxu2 }
 0x3c3   :  { %v247_v32 = vadd.f32 %v313_v30, %v244_v31 }
 0x3c5   :  { %332 = vtanh.f32 %v247_v32 }
 0x3cb   :  { %v333_v33 = vpop.eup %332 }
 0x3cc   :  { %315 = vst.msk [vmem:[%s441_s2 + $0xc] sm:$0x3] %vm17_vm0, %v333_v33  ;;  %317 = vmatmul.msk.f32.vlgmr.msrb.gmra.mxu3 %vm25_vm1, %v333_v33 }
 0x44f   :  { %v277_v35 = vpop.f32.mrf.mxu3 }
 0x450   :  { %v280_v36 = vadd.f32 %v316_v34, %v277_v35 }
 0x452   :  { %334 = vtanh.f32 %v280_v36 }
 0x458   :  { %v335_v37 = vpop.eup %334 }
 0x459   :  { %318 = vst.msk [vmem:[%s441_s2 + $0xe] sm:$0x3] %vm17_vm0, %v335_v37 }
 0x45a   :  { %284 = vst.msk [vmem:[#allocation2] sm:$0x3] %vm17_vm0, %v335_v37 }
 0x45b   :  { %288 = vst.msk [vmem:[%s442_s3] sm:$0x3] %vm17_vm0, %v335_v37 }

// kernel: model_forward.8
= control target key start
LH: loop header
LB: loop body
LE: loop exit
PB: predicated region body
PF: predicated region fallthrough
CT: control target
= control target key end

     0   :  { %9 = vsyncpa [#allocation4], 0  ;;  %s382_s15 = smov [#allocation3]   ;;  %s383_s17 = smov 128   ;;  %s479_s0 = inlined_call_operand.vmem [shape: f32[8,2,32], index: 0, kind: input, shape index: {}]   ;;  %s480_s1 = inlined_call_operand.hbm [shape: f32[32,32], index: 1, kind: input, shape index: {}]   ;;  %s481_s2 = inlined_call_operand.vmem [shape: f32[8,2,32], index: 2, kind: output, shape index: {0}]   ;;  %s482_s3 = inlined_call_operand.vmem [shape: f32[2,32], index: 3, kind: output, shape index: {1}]  }
   0x1   :  { %s16_s14 = sshll.u32 %s480_s1, 4  ;;  %s18_s16 = sshll.u32 %s382_s15, 4  ;;  %s17_s14 = int_to_ptr.hbm [resolvable:$true] %s16_s14  ;;  %s19_s16 = int_to_ptr.vmem [resolvable:$true] %s18_s16 }
   0x2   :  { %s384_s18 = smov 8  }
   0x3   :  { %24 = dma.hbm_to_vmem [thread:$0]  %s17_s14, 512, %s19_s16, [#allocation4], %s383_s17, %s383_s17, %s384_s18  }
   0x4   :  { %380 = dma.done.wait [#allocation4], 512  }
   0x5   :  { %381 = vsyncadd [#allocation4], 4294966784  ;;  %vm33_vm0 = vcmask 254976   ;;  %v385_v0 = vmov 0.0   ;;  %v40_v1 = vld [vmem:[#allocation3 + $0x18] sm:$0xff]  ;;  %v39_v2 = vld [vmem:[#allocation3 + $0x10] sm:$0xff] }
   0x6   :  { %34 = vst.msk [vmem:[#allocation2] sm:$0x3] %vm33_vm0, %v385_v0  ;;  %57 = vmatpush.msra.mxu0 %v40_v1  ;;  %90 = vmatpush.msra.mxu1 %v40_v1  ;;  %v38_v3 = vld [vmem:[#allocation3 + $0x8] sm:$0xff]  ;;  %v37_v4 = vld [vmem:[#allocation3] sm:$0xff]  ;;  %vm41_vm1 = vcmask 261120  }
   0x7   :  { %123 = vmatpush.msra.mxu2 %v40_v1  ;;  %156 = vmatpush.msra.mxu3 %v40_v1  ;;  %v36_v6 = vld [vmem:[%s479_s0] sm:$0x3]  ;;  %v315_v10 = vld [vmem:[%s479_s0 + $0x2] sm:$0x3]  ;;  %v318_v14 = vld [vmem:[%s479_s0 + $0x4] sm:$0x3] }
   0x8   :  { %58 = vmatpush.msra.mxu0 %v39_v2  ;;  %91 = vmatpush.msra.mxu1 %v39_v2  ;;  %v321_v18 = vld [vmem:[%s479_s0 + $0x6] sm:$0x3]  ;;  %v324_v22 = vld [vmem:[%s479_s0 + $0x8] sm:$0x3]  ;;  %v327_v26 = vld [vmem:[%s479_s0 + $0xa] sm:$0x3] }
   0x9   :  { %124 = vmatpush.msra.mxu2 %v39_v2  ;;  %157 = vmatpush.msra.mxu3 %v39_v2  ;;  %v330_v30 = vld [vmem:[%s479_s0 + $0xc] sm:$0x3]  ;;  %v333_v34 = vld [vmem:[%s479_s0 + $0xe] sm:$0x3] }
   0xa   :  { %59 = vmatpush.msra.mxu0 %v38_v3  ;;  %92 = vmatpush.msra.mxu1 %v38_v3 }
   0xb   :  { %125 = vmatpush.msra.mxu2 %v38_v3  ;;  %158 = vmatpush.msra.mxu3 %v38_v3 }
   0xc   :  { %60 = vmatpush.msra.mxu0 %v37_v4  ;;  %93 = vmatpush.msra.mxu1 %v37_v4 }
   0xd   :  { %v35_v5 = vld [vmem:[#allocation2] sm:$0x3]  ;;  %126 = vmatpush.msra.mxu2 %v37_v4  ;;  %159 = vmatpush.msra.mxu3 %v37_v4 }
   0xe   :  { %314 = vmatmul.msk.f32.vlgmr.msra.gmra.mxu0 %vm41_vm1, %v35_v5  ;;  %222 = vmatpush.msrb.mxu1 %v40_v1 }
   0xf   :  { %189 = vmatpush.msrb.mxu0 %v40_v1  ;;  %255 = vmatpush.msrb.mxu2 %v40_v1 }
  0x10   :  { %288 = vmatpush.msrb.mxu3 %v40_v1  ;;  %223 = vmatpush.msrb.mxu1 %v39_v2 }
  0x11   :  { %190 = vmatpush.msrb.mxu0 %v39_v2  ;;  %256 = vmatpush.msrb.mxu2 %v39_v2 }
  0x12   :  { %289 = vmatpush.msrb.mxu3 %v39_v2  ;;  %224 = vmatpush.msrb.mxu1 %v38_v3 }
  0x13   :  { %191 = vmatpush.msrb.mxu0 %v38_v3  ;;  %257 = vmatpush.msrb.mxu2 %v38_v3 }
  0x14   :  { %290 = vmatpush.msrb.mxu3 %v38_v3  ;;  %225 = vmatpush.msrb.mxu1 %v37_v4 }
  0x15   :  { %192 = vmatpush.msrb.mxu0 %v37_v4  ;;  %258 = vmatpush.msrb.mxu2 %v37_v4 }
  0x16   :  { %291 = vmatpush.msrb.mxu3 %v37_v4 }
  0x8b   :  { %v62_v7 = vpop.f32.mrf.mxu0 }
  0x8c   :  { %v65_v8 = vadd.f32 %v62_v7, %v36_v6 }
  0x8e   :  { %340 = vtanh.f32 %v65_v8 }
  0x94   :  { %v341_v9 = vpop.eup %340 }
  0x95   :  { %68 = vst.msk [vmem:[%s481_s2] sm:$0x3] %vm33_vm0, %v341_v9  ;;  %316 = vmatmul.msk.f32.vlgmr.msra.gmra.mxu1 %vm41_vm1, %v341_v9 }
 0x112   :  { %v95_v11 = vpop.f32.mrf.mxu1 }
 0x113   :  { %v98_v12 = vadd.f32 %v315_v10, %v95_v11 }
 0x115   :  { %342 = vtanh.f32 %v98_v12 }
 0x11b   :  { %v343_v13 = vpop.eup %342 }
 0x11c   :  { %317 = vst.msk [vmem:[%s481_s2 + $0x2] sm:$0x3] %vm33_vm0, %v343_v13  ;;  %319 = vmatmul.msk.f32.vlgmr.msra.gmra.mxu2 %vm41_vm1, %v343_v13 }
 0x19f   :  { %v128_v15 = vpop.f32.mrf.mxu2 }
 0x1a0   :  { %v131_v16 = vadd.f32 %v318_v14, %v128_v15 }
 0x1a2   :  { %344 = vtanh.f32 %v131_v16 }
 0x1a8   :  { %v345_v17 = vpop.eup %344 }
 0x1a9   :  { %320 = vst.msk [vmem:[%s481_s2 + $0x4] sm:$0x3] %vm33_vm0, %v345_v17  ;;  %322 = vmatmul.msk.f32.vlgmr.msra.gmra.mxu3 %vm41_vm1, %v345_v17 }
 0x22c   :  { %v161_v19 = vpop.f32.mrf.mxu3 }
 0x22d   :  { %v164_v20 = vadd.f32 %v321_v18, %v161_v19 }
 0x22f   :  { %346 = vtanh.f32 %v164_v20 }
 0x235   :  { %v347_v21 = vpop.eup %346 }
 0x236   :  { %323 = vst.msk [vmem:[%s481_s2 + $0x6] sm:$0x3] %vm33_vm0, %v347_v21  ;;  %325 = vmatmul.msk.f32.vlgmr.msrb.gmra.mxu0 %vm41_vm1, %v347_v21 }
 0x2b3   :  { %v194_v23 = vpop.f32.mrf.mxu0 }
 0x2b4   :  { %v197_v24 = vadd.f32 %v324_v22, %v194_v23 }
 0x2b6   :  { %348 = vtanh.f32 %v197_v24 }
 0x2bc   :  { %v349_v25 = vpop.eup %348 }
 0x2bd   :  { %326 = vst.msk [vmem:[%s481_s2 + $0x8] sm:$0x3] %vm33_vm0, %v349_v25  ;;  %328 = vmatmul.msk.f32.vlgmr.msrb.gmra.mxu1 %vm41_vm1, %v349_v25 }
 0x33a   :  { %v227_v27 = vpop.f32.mrf.mxu1 }
 0x33b   :  { %v230_v28 = vadd.f32 %v327_v26, %v227_v27 }
 0x33d   :  { %350 = vtanh.f32 %v230_v28 }
 0x343   :  { %v351_v29 = vpop.eup %350 }
 0x344   :  { %329 = vst.msk [vmem:[%s481_s2 + $0xa] sm:$0x3] %vm33_vm0, %v351_v29  ;;  %331 = vmatmul.msk.f32.vlgmr.msrb.gmra.mxu2 %vm41_vm1, %v351_v29 }
 0x3c7   :  { %v260_v31 = vpop.f32.mrf.mxu2 }
 0x3c8   :  { %v263_v32 = vadd.f32 %v330_v30, %v260_v31 }
 0x3ca   :  { %352 = vtanh.f32 %v263_v32 }
 0x3d0   :  { %v353_v33 = vpop.eup %352 }
 0x3d1   :  { %332 = vst.msk [vmem:[%s481_s2 + $0xc] sm:$0x3] %vm33_vm0, %v353_v33  ;;  %334 = vmatmul.msk.f32.vlgmr.msrb.gmra.mxu3 %vm41_vm1, %v353_v33 }
 0x454   :  { %v293_v35 = vpop.f32.mrf.mxu3 }
 0x455   :  { %v296_v36 = vadd.f32 %v333_v34, %v293_v35 }
 0x457   :  { %354 = vtanh.f32 %v296_v36 }
 0x45d   :  { %v355_v37 = vpop.eup %354 }
 0x45e   :  { %335 = vst.msk [vmem:[%s481_s2 + $0xe] sm:$0x3] %vm33_vm0, %v355_v37 }
 0x45f   :  { %300 = vst.msk [vmem:[#allocation2] sm:$0x3] %vm33_vm0, %v355_v37 }
 0x460   :  { %304 = vst.msk [vmem:[%s482_s3] sm:$0x3] %vm33_vm0, %v355_v37 }
 0x461   :  { %313 = vsyncpa [#allocation4], 1 }

// kernel: model_forward.9
= control target key start
LH: loop header
LB: loop body
LE: loop exit
PB: predicated region body
PF: predicated region fallthrough
CT: control target
= control target key end

     0   :  { %vm24_vm0 = vcmask 261120   ;;  %vm54_vm1 = vcmask 97280   ;;  %s115_s1 = inlined_call_operand.vmem [shape: f32[32,12], index: 1, kind: input, shape index: {}]   ;;  %s116_s2 = inlined_call_operand.vmem [shape: f32[1,12], index: 2, kind: input, shape index: {}]   ;;  %s117_s0 = inlined_call_operand.vmem [shape: f32[16,32], index: 0, kind: input, shape index: {}]   ;;  %s118_s3 = inlined_call_operand.vmem [shape: f32[16,12], index: 3, kind: output, shape index: {}]  }
   0x1   :  { %v19_v0 = vld [vmem:[%s115_s1 + $0x18] sm:$0xff]  ;;  %v18_v1 = vld [vmem:[%s115_s1 + $0x10] sm:$0xff]  ;;  %v17_v2 = vld [vmem:[%s115_s1 + $0x8] sm:$0xff] }
   0x2   :  { %43 = vmatpush.msra.mxu0 %v19_v0  ;;  %63 = vmatpush.msra.mxu1 %v19_v0  ;;  %v16_v3 = vld [vmem:[%s115_s1] sm:$0xff]  ;;  %v15_v5 = vld [vmem:[%s117_s0 + $0x8] sm:$0xff] }
   0x3   :  { %v14_v4 = vld [vmem:[%s117_s0] sm:$0xff] }
   0x4   :  { %44 = vmatpush.msra.mxu0 %v18_v1  ;;  %64 = vmatpush.msra.mxu1 %v18_v1  ;;  %v67_v6 = vld [vmem:[%s116_s2] ss:$0 sm:$0xff] }
   0x6   :  { %45 = vmatpush.msra.mxu0 %v17_v2  ;;  %65 = vmatpush.msra.mxu1 %v17_v2 }
   0x8   :  { %46 = vmatpush.msra.mxu0 %v16_v3  ;;  %66 = vmatpush.msra.mxu1 %v16_v3 }
   0x9   :  { %61 = vmatmul.msk.f32.vlgmr.msra.gmra.mxu0 %vm24_vm0, %v14_v4  ;;  %62 = vmatmul.msk.f32.vlgmr.msra.gmra.mxu1 %vm24_vm0, %v15_v5 }
  0x86   :  { %v48_v7 = vpop.f32.mrf.mxu0  ;;  %v51_v8 = vpop.f32.mrf.mxu1 }
  0x87   :  { %v49_v9 = vadd.f32 %v67_v6, %v48_v7  ;;  %v52_v10 = vadd.f32 %v67_v6, %v51_v8 }
  0x89   :  { %55 = vst.msk [vmem:[%s118_s3] sm:$0xff] %vm54_vm1, %v49_v9 }
  0x8a   :  { %56 = vst.msk [vmem:[%s118_s3 + $0x8] sm:$0xff] %vm54_vm1, %v52_v10 }

</bundles_post_ra>
